<compile_context>
chip_gen: v7x
topology: tpu7x:2x2x1
jax: 0.10.0
libtpu: 0.0.40
codegen_flags: <defaults>
</compile_context>

<pallas_src>
import math

import jax
import jax.numpy as jnp
import numpy as np
from jax.experimental import pallas as pl
from jax.experimental.pallas import tpu as pltpu


def _attn_pred_kernel(x_ref, w_ref, bias_ref, o_ref):
    """o = x @ W_masked + bias_masked.

    x_ref:    (tm, L)   chunk of packed batch rows (L = P * B * NB lanes)
    w_ref:    (L, L)    block-diagonal I_P (x) (W^T (x) I_NB) * mask (resident)
    bias_ref: (1, L)    (pbf + pbb_gathered) * mask, tiled P times (resident)
    o_ref:    (tm, L)
    """
    acc = jnp.dot(x_ref[...], w_ref[...], preferred_element_type=jnp.float32)
    o_ref[...] = (acc + bias_ref[...]).astype(o_ref.dtype)


def _round_up(x, m):
    return ((x + m - 1) // m) * m


def _choose_row_chunk(rows, lanes, dtype_bytes, target_block_bytes):
    """Rows per grid step: ~target_block_bytes per block, clamped to batch."""
    tm = max(8, (target_block_bytes // (lanes * dtype_bytes)) // 8 * 8)
    rows_r = _round_up(rows, 8)
    tm = min(tm, rows_r)
    # Prefer >=2 grid steps when possible (pipelining; v7x dual-TC sharding).
    if rows_r <= tm and rows_r > 8:
        tm = _round_up(-(-rows_r // 2), 8)
    return tm


def attn_pred_forward(x, alpha, beta, pbf_param, pbb_gathered, mask,
                      past_steps, *, target_block_bytes=2 << 20):
    """Training-mode forward of Attn_Pred_Model.

    x:            (batch, B, NB)
    alpha, beta:  (1,) scalars
    pbf_param:    (1, NB)   forward positional bias
    pbb_gathered: (B, NB)   backward positional bias already gathered by arange2
    mask:         (B, NB)
    """
    batch, B, NB = x.shape
    f32 = jnp.float32
    per = B * NB
    in_dtype = x.dtype
    dtype_bytes = jnp.dtype(in_dtype).itemsize

    # ---- grid/batch-invariant precompute (tiny, done once in the wrapper) ---
    # Banded shift-sum matrix: W[j, i] = alpha * beta**s  for  j == i + s + 1.
    idx = jnp.arange(B)
    row = idx[:, None]
    col = idx[None, :]
    w = jnp.zeros((B, B), f32)
    coef = alpha.reshape(()).astype(f32)
    beta_s = beta.reshape(()).astype(f32)
    for i in range(past_steps):
        w = w + coef * (row == col + (i + 1)).astype(f32)
        coef = coef * beta_s

    mask_f = mask.astype(f32)
    mask_flat = mask_f.reshape(1, per)
    bias_flat = ((jnp.broadcast_to(pbf_param.astype(f32), (B, NB))
                  + pbb_gathered.astype(f32)) * mask_f).reshape(1, per)

    # Right-multiplication matrix on the flattened (B*NB) axis, output mask
    # folded into its columns:  out_flat = x_flat @ ((W^T (x) I_NB) * m) + b.
    m_small = jnp.kron(w.T, jnp.eye(NB, dtype=f32)) * mask_flat      # (per,per)

    # Pack P consecutive batch elements per row so the lane dim is a multiple
    # of 128 — a FREE row-major reshape; no transposes anywhere.
    P = 128 // math.gcd(per, 128)
    lanes = P * per
    w_big = jnp.kron(jnp.eye(P, dtype=f32), m_small).astype(in_dtype)  # (L,L)
    bias_row = jnp.tile(bias_flat, (1, P))                             # (1,L)

    rows = -(-batch // P)
    tm = _choose_row_chunk(rows, lanes, dtype_bytes, target_block_bytes)
    rows_padded = _round_up(rows, tm)
    batch_padded = rows_padded * P
    if batch_padded != batch:
        x = jnp.pad(x, ((0, batch_padded - batch), (0, 0), (0, 0)))
    x2 = x.reshape(rows_padded, lanes)   # free regrouping in row-major

    grid = (rows_padded // tm,)
    cost = pl.CostEstimate(
        flops=int(2 * rows_padded * lanes * lanes),
        transcendentals=0,
        bytes_accessed=int(rows_padded * lanes * 2 * dtype_bytes
                           + lanes * lanes * dtype_bytes + lanes * 4),
    )

    out2 = pl.pallas_call(
        _attn_pred_kernel,
        out_shape=jax.ShapeDtypeStruct((rows_padded, lanes), in_dtype),
        grid=grid,
        in_specs=[
            pl.BlockSpec((tm, lanes), lambda r: (r, 0)),      # x chunk
            pl.BlockSpec((lanes, lanes), lambda r: (0, 0)),   # W (resident)
            pl.BlockSpec((1, lanes), lambda r: (0, 0)),       # bias*mask row
        ],
        out_specs=pl.BlockSpec((tm, lanes), lambda r: (r, 0)),
        compiler_params=pltpu.CompilerParams(
            dimension_semantics=("parallel",)),
        cost_estimate=cost,
    )(x2, w_big, bias_row)

    # Free reshape back + slice off batch padding.
    return out2.reshape(batch_padded, B, NB)[:batch]


if __name__ == "__main__":
    # Module hyper-parameters (small, consistent with the forward pass).
    attn_block_size = 16
    num_buckets = 4
    bucket_size = 4
    past_steps = 3
    buckets_minimum = 1
    batch = 2
    B, NB = attn_block_size, num_buckets

    key = jax.random.PRNGKey(0)
    kx, kf, kb, ka, kbeta = jax.random.split(key, 5)

    # Input: (..., attn_block_size, num_buckets)
    x = jax.random.normal(kx, (batch, B, NB), dtype=jnp.float32)

    # Parameters (shapes per __init__; perturbed from the zeros/ones defaults
    # so the test is non-trivial).
    pbf_param = 0.1 * jax.random.normal(kf, (1, NB), dtype=jnp.float32)
    pbb_param = 0.1 * jax.random.normal(kb, (1, NB), dtype=jnp.float32)
    alpha = (jnp.ones((1,), jnp.float32)
             + 0.05 * jax.random.normal(ka, (1,), dtype=jnp.float32))
    beta = (jnp.ones((1,), jnp.float32)
            - 0.1 * jnp.abs(jax.random.normal(kbeta, (1,), dtype=jnp.float32)))

    # Buffers (exact replica of the PyTorch __init__ buffer math).
    idx = jnp.arange(B)
    arange1 = jnp.tile(idx[:, None], (1, B))
    arange2_full = (arange1 - idx[None, :]) % B
    arange2_full = (arange2_full / num_buckets).astype(jnp.int32)
    cols = jnp.arange(num_buckets) * num_buckets
    arange2 = arange2_full[:, cols]                               # (B, NB)

    ones_vec = jnp.ones((B, 1), jnp.float32)
    mask = jnp.tril(jnp.ones((B, B), jnp.float32), k=-bucket_size)[:, cols]
    mask = mask.at[: buckets_minimum * bucket_size].set(0.0)      # (B, NB)

    # Parameter/index plumbing done once outside the kernel:
    # torch.gather(ones_vec @ pbb_param, -1, arange2).
    pbb_full = ones_vec @ pbb_param                               # (B, NB)
    pbb_gathered = jnp.take_along_axis(pbb_full, arange2, axis=-1)

    out = attn_pred_forward(x, alpha, beta, pbf_param, pbb_gathered, mask,
                            past_steps)
    out = jax.block_until_ready(out)

    # Pure-JAX reference of the PyTorch training-mode forward.
    ref = jnp.zeros_like(x)
    for i in range(past_steps):
        shifted = jnp.pad(x[..., : -(i + 1), :], ((0, 0), (i + 1, 0), (0, 0)))
        ref = ref + alpha[0] * (beta[0] ** i) * shifted
    ref = ref + (ones_vec @ pbf_param)
    ref = ref + pbb_gathered
    ref = ref * mask

    np.testing.assert_allclose(np.asarray(out), np.asarray(ref),
                               atol=1e-5, rtol=1e-5)
    print("KERNEL_OK")
</pallas_src>

<mosaic_0001>
module attributes {stable_mosaic.version = 11 : i64} {
  func.func @_attn_pred_kernel(%arg0: i32, %arg1: memref<8x128xf32, #tpu.memory_space<vmem>>, %arg2: memref<128x128xf32, #tpu.memory_space<vmem>>, %arg3: memref<1x128xf32, #tpu.memory_space<vmem>>, %arg4: memref<8x128xf32, #tpu.memory_space<vmem>>) attributes {dimension_semantics = [#tpu.dimension_semantics<parallel>], iteration_bounds = array<i64: 1>, scalar_prefetch = 0 : i64, scratch_operands = 0 : i64, tpu.core_type = #tpu.core_type<tc>, window_params = [{transform_indices = @transform_0, window_bounds = array<i64: 8, 128>}, {pipeline_mode = #tpu.pipeline_mode<synchronous>, transform_indices = @transform_1, window_bounds = array<i64: 128, 128>}, {pipeline_mode = #tpu.pipeline_mode<synchronous>, transform_indices = @transform_2, window_bounds = array<i64: 1, 128>}, {transform_indices = @transform_3, window_bounds = array<i64: 8, 128>}]} {
    %c0 = arith.constant 0 : index
    %c0_0 = arith.constant 0 : index
    %0 = vector.load %arg1[%c0, %c0_0] : memref<8x128xf32, #tpu.memory_space<vmem>>, vector<8x128xf32>
    %c0_1 = arith.constant 0 : index
    %c0_2 = arith.constant 0 : index
    %1 = vector.load %arg2[%c0_1, %c0_2] : memref<128x128xf32, #tpu.memory_space<vmem>>, vector<128x128xf32>
    %cst = arith.constant dense<0.000000e+00> : vector<8x128xf32>
    %2 = tpu.matmul %0, %1, %cst {dimension_numbers = #tpu.dot_dimension_numbers<[1], [0], [0], [1], [0, 0, 1, 1], [], []>} : vector<8x128xf32>, vector<128x128xf32>, vector<8x128xf32> -> vector<8x128xf32>
    %c0_3 = arith.constant 0 : index
    %c0_4 = arith.constant 0 : index
    %3 = vector.load %arg3[%c0_3, %c0_4] : memref<1x128xf32, #tpu.memory_space<vmem>>, vector<1x128xf32>
    %4 = vector.broadcast %3 : vector<1x128xf32> to vector<8x128xf32>
    %5 = arith.addf %2, %4 : vector<8x128xf32>
    %c0_5 = arith.constant 0 : index
    %c0_6 = arith.constant 0 : index
    %6 = vector.load %arg4[%c0_5, %c0_6] : memref<8x128xf32, #tpu.memory_space<vmem>>, vector<8x128xf32>
    tpu.vector_store %arg4[%c0_5, %c0_6], %5 {strides = array<i32>} : memref<8x128xf32, #tpu.memory_space<vmem>>, vector<8x128xf32>,
    return
  }
  func.func @transform_0(%arg0: i32) -> (i32, i32) {
    %c0_i32 = arith.constant 0 : i32
    %c0_i32_0 = arith.constant 0 : i32
    return %arg0, %c0_i32 : i32, i32
  }
  func.func @transform_1(%arg0: i32) -> (i32, i32) {
    %c0_i32 = arith.constant 0 : i32
    %c0_i32_0 = arith.constant 0 : i32
    %c0_i32_1 = arith.constant 0 : i32
    return %c0_i32, %c0_i32_0 : i32, i32
  }
  func.func @transform_2(%arg0: i32) -> (i32, i32) {
    %c0_i32 = arith.constant 0 : i32
    %c0_i32_0 = arith.constant 0 : i32
    %c0_i32_1 = arith.constant 0 : i32
    return %c0_i32, %c0_i32_0 : i32, i32
  }
  func.func @transform_3(%arg0: i32) -> (i32, i32) {
    %c0_i32 = arith.constant 0 : i32
    %c0_i32_0 = arith.constant 0 : i32
    return %arg0, %c0_i32 : i32, i32
  }
}

</mosaic_0001>

<bundles_post_ra>
// kernel: tpu_custom_call.1
= control target key start
LH: loop header
LB: loop body
LE: loop exit
PB: predicated region body
PF: predicated region fallthrough
CT: control target
= control target key end

     0   :  { %8 = vsyncpa [#allocation3], 0  ;;  %s383_s0 = inlined_call_operand.hbm [shape: f32[8,128], index: 0, kind: input, shape index: {}]   ;;  %s384_s1 = inlined_call_operand.hbm [shape: f32[128,128], index: 1, kind: input, shape index: {}]   ;;  %s385_s2 = inlined_call_operand.vmem [shape: f32[1,128], index: 2, kind: input, shape index: {}]   ;;  %s386_s3 = inlined_call_operand.hbm [shape: f32[8,128], index: 3, kind: output, shape index: {}]  }
   0x1   :  { %9 = vsyncpa [#allocation6], 0 }
   0x2   :  { %10 = vsyncpa [#allocation4], 0  ;;  %s309_s12 = smov [#allocation2]   ;;  %s310_s14 = smov [#allocation5]  }
   0x3   :  { %s17_s13 = sshll.u32 %s309_s12, 4  ;;  %s26_s15 = sshll.u32 %s310_s14, 4  ;;  %s18_s13 = int_to_ptr.vmem [resolvable:$true] %s17_s13  ;;  %s337_s15 = int_to_ptr.vmem [resolvable:$true] %s26_s15 }
   0x4   :  { %s237_s18 = scalar_lea.hbm %s383_s0, 128 }
   0x5   :  { %p238_p0 = scmp.ne.s32.totalorder %s383_s0, %s237_s18  ;;  %p241_p1 = scmp.lt.u32.totalorder %s237_s18, %s383_s0 }
   0x7   :  { %p243_p2 = pnand %p241_p1, %p238_p0 }
   0x9   :  { %246 = shalt.err (!%p243_p2)
}
   0xa   :  { %s247_s23 = scalar_lea.vmem %s18_s13, 128  ;;  %p252_p4 = scmp.lt.s32.totalorder %s18_s13, %s18_s13 }
   0xb   :  { %p248_p3 = scmp.ne.s32.totalorder %s18_s13, %s247_s23  ;;  %p253_p5 = scmp.lt.s32.totalorder %s247_s23, %s247_s23 }
   0xd   :  { %p254_p6 = por %p253_p5, %p252_p4 }
   0xf   :  { %p255_p7 = pnand %p254_p6, %p248_p3 }
  0x11   :  { %258 = shalt.err (!%p255_p7)
}
  0x12   :  { %20 = dma.hbm_to_vmem [thread:$0]  %s383_s0, 128, %s18_s13, [#allocation3]  }
  0x13   :  { %s259_s28 = scalar_lea.hbm %s384_s1, 2048 }
  0x14   :  { %p260_p8 = scmp.ne.s32.totalorder %s384_s1, %s259_s28  ;;  %p263_p9 = scmp.lt.u32.totalorder %s259_s28, %s384_s1 }
  0x16   :  { %p265_p10 = pnand %p263_p9, %p260_p8 }
  0x18   :  { %268 = shalt.err (!%p265_p10)
}
  0x19   :  { %s269_s6 = scalar_lea.vmem %s337_s15, 2048  ;;  %p274_p12 = scmp.lt.s32.totalorder %s337_s15, %s337_s15 }
  0x1a   :  { %p270_p11 = scmp.ne.s32.totalorder %s337_s15, %s269_s6  ;;  %p275_p13 = scmp.lt.s32.totalorder %s269_s6, %s269_s6 }
  0x1c   :  { %p276_p0 = por %p275_p13, %p274_p12 }
  0x1e   :  { %p277_p1 = pnand %p276_p0, %p270_p11 }
  0x20   :  { %280 = shalt.err (!%p277_p1)
}
  0x21   :  { %s311_s0 = smov 128   ;;  %s312_s7 = smov 8  }
  0x22   :  { %32 = dma.hbm_to_vmem [thread:$0]  %s384_s1, 2048, %s337_s15, [#allocation6], %s311_s0, %s311_s0, %s312_s7  }
  0x23   :  { %303 = dma.done.wait [#allocation3], 128  }
  0x24   :  { %304 = vsyncadd [#allocation3], 4294967168 }
  0x25   :  { %305 = dma.done.wait [#allocation6], 2048  }
  0x26   :  { %306 = vsyncadd [#allocation6], 4294965248  ;;  %v313_v0 = vmov 0.0|0.0   ;;  %vm314_vm0 = vmmov 0   ;;  %v315_v1 = vmov 0.0   ;;  %v42_v2 = vld [vmem:[#allocation5] sm:$0xff] }
  0x27   :  { %205 = vmatprep.subr.bf16.mxu0 %v313_v0  ;;  %202 = vmatprep.mubr.msk.f32.mxu0 %vm314_vm0, %v315_v1  ;;  %v43_v3 = vld [vmem:[#allocation5 + $0x8] sm:$0xff]  ;;  %v44_v4 = vld [vmem:[#allocation5 + $0x10] sm:$0xff]  ;;  %v45_v6 = vld [vmem:[#allocation5 + $0x18] sm:$0xff]  ;;  %s316_s11 = smov [#allocation7]  }
  0x28   :  { %v206_v5 = vpack.c.bf16 %v43_v3, %v42_v2  ;;  %v209_v7 = vpack.c.bf16 %v45_v6, %v44_v4  ;;  %v46_v8 = vld [vmem:[#allocation5 + $0x20] sm:$0xff]  ;;  %v47_v9 = vld [vmem:[#allocation5 + $0x28] sm:$0xff]  ;;  %v48_v11 = vld [vmem:[#allocation5 + $0x30] sm:$0xff]  ;;  %s142_s12 = sshll.u32 %s316_s11, 4  ;;  %s143_s12 = int_to_ptr.vmem [resolvable:$true] %s142_s12 }
  0x29   :  { %v212_v10 = vpack.c.bf16 %v47_v9, %v46_v8  ;;  %v49_v12 = vld [vmem:[#allocation5 + $0x38] sm:$0xff]  ;;  %v50_v14 = vld [vmem:[#allocation5 + $0x40] sm:$0xff]  ;;  %v51_v15 = vld [vmem:[#allocation5 + $0x48] sm:$0xff]  ;;  %s281_s13 = scalar_lea.vmem %s143_s12, 128  ;;  %p286_p3 = scmp.lt.s32.totalorder %s143_s12, %s143_s12 }
  0x2a   :  { %207 = vmatpush3.bf16.msra.mxu0 %v206_v5  ;;  %v215_v13 = vpack.c.bf16 %v49_v12, %v48_v11  ;;  %v218_v16 = vpack.c.bf16 %v51_v15, %v50_v14  ;;  %v52_v17 = vld [vmem:[#allocation5 + $0x50] sm:$0xff]  ;;  %v53_v18 = vld [vmem:[#allocation5 + $0x58] sm:$0xff]  ;;  %v54_v20 = vld [vmem:[#allocation5 + $0x60] sm:$0xff]  ;;  %p282_p2 = scmp.ne.s32.totalorder %s143_s12, %s281_s13  ;;  %p287_p4 = scmp.lt.s32.totalorder %s281_s13, %s281_s13 }
  0x2b   :  { %208 = vmatprep.subr.bf16.mxu0 %v313_v0  ;;  %v221_v19 = vpack.c.bf16 %v53_v18, %v52_v17  ;;  %v55_v21 = vld [vmem:[#allocation5 + $0x68] sm:$0xff]  ;;  %v56_v23 = vld [vmem:[#allocation5 + $0x70] sm:$0xff]  ;;  %v57_v24 = vld [vmem:[#allocation5 + $0x78] sm:$0xff] }
  0x2c   :  { %v224_v22 = vpack.c.bf16 %v55_v21, %v54_v20  ;;  %v227_v25 = vpack.c.bf16 %v57_v24, %v56_v23  ;;  %v41_v26 = vld [vmem:[#allocation2] sm:$0xff]  ;;  %p288_p5 = por %p287_p4, %p286_p3 }
  0x2d   :  { %v152_v27 = vld [vmem:[%s385_s2] ss:$0 sm:$0xff] }
  0x2e   :  { %210 = vmatpush3.bf16.msra.mxu0 %v209_v7  ;;  %p289_p6 = pnand %p288_p5, %p282_p2 }
  0x2f   :  { %211 = vmatprep.subr.bf16.mxu0 %v313_v0 }
  0x32   :  { %213 = vmatpush3.bf16.msra.mxu0 %v212_v10 }
  0x33   :  { %214 = vmatprep.subr.bf16.mxu0 %v313_v0 }
  0x36   :  { %216 = vmatpush3.bf16.msra.mxu0 %v215_v13 }
  0x37   :  { %217 = vmatprep.subr.bf16.mxu0 %v313_v0 }
  0x3a   :  { %219 = vmatpush3.bf16.msra.mxu0 %v218_v16 }
  0x3b   :  { %220 = vmatprep.subr.bf16.mxu0 %v313_v0 }
  0x3e   :  { %222 = vmatpush3.bf16.msra.mxu0 %v221_v19 }
  0x3f   :  { %223 = vmatprep.subr.bf16.mxu0 %v313_v0 }
  0x42   :  { %225 = vmatpush3.bf16.msra.mxu0 %v224_v22 }
  0x43   :  { %226 = vmatprep.subr.bf16.mxu0 %v313_v0 }
  0x46   :  { %228 = vmatpush3.bf16.msra.mxu0 %v227_v25 }
  0x49   :  { %203 = vmatmul.mubr.f32.vlgmr.msra.gmra.mrb[0].mxu0 %v41_v26 }
 0x11c   :  { %v131_v28 = vpop.f32.mrb[0].mxu0 }
 0x11d   :  { %v132_v29 = vadd.f32 %v152_v27, %v131_v28  ;;  %v204_v30 = vpop.f32.mrb[1].mxu0 }
 0x11f   :  { %135 = vst [vmem:[#allocation7] sm:$0xff] %v132_v29 }
 0x120   :  { %292 = shalt.err (!%p289_p6)
}
 0x121   :  { %s293_s16 = scalar_lea.hbm %s386_s3, 128 }
 0x122   :  { %p294_p7 = scmp.ne.s32.totalorder %s386_s3, %s293_s16  ;;  %p297_p8 = scmp.lt.u32.totalorder %s293_s16, %s386_s3 }
 0x124   :  { %p299_p9 = pnand %p297_p8, %p294_p7 }
 0x126   :  { %302 = shalt.err (!%p299_p9)
}
 0x127   :  { %145 = dma.vmem_to_hbm [thread:$0]  %s143_s12, 128, %s386_s3, [#allocation4]  }
 0x128   :  { %307 = dma.done.wait [#allocation4], 128  }
 0x129   :  { %308 = vsyncadd [#allocation4], 4294967168 }
 0x12a   :  { %149 = vsyncpa [#allocation3], 1 }
 0x12b   :  { %150 = vsyncpa [#allocation6], 1 }
 0x12c   :  { %151 = vsyncpa [#allocation4], 1 }

</bundles_post_ra>
